<compile_context>
chip_gen: v5e
topology: v5e:2x2
jax: 0.10.0
libtpu: 0.0.40
codegen_flags: <defaults>
</compile_context>

<pallas_src>
import functools
import math

import jax
import jax.numpy as jnp
from jax.experimental import pallas as pl
from jax.experimental.pallas import tpu as pltpu

_LANE = 128
_TILED_BATCH_THRESHOLD = 1024  # below this, per-grid-step overhead dominates
_TB = 512                      # f32 batch-tile rows for the gridded path


def _round_up(x, m):
    return ((x + m - 1) // m) * m


def _sigmoid(z, approx):
    # exp lands on the EUP; reciprocal goes to EUP vrcp when approx=True,
    # keeping the VALU slots free for the bias adds.
    return pl.reciprocal(1.0 + jnp.exp(-z), approx=approx)


def mlp_kernel(x_ref, w1_ref, b1_ref, w2_ref, b2_ref, o_ref, *, compute_dtype,
               approx_recip):
    x = x_ref[...]
    # Matmul inputs in compute_dtype (bf16 doubles MXU rate on v6e/v7x);
    # always accumulate in f32. Bias + sigmoid math stays f32.
    z1 = jnp.dot(x.astype(compute_dtype), w1_ref[...].astype(compute_dtype),
                 preferred_element_type=jnp.float32) + b1_ref[...]
    h = _sigmoid(z1, approx_recip)
    z2 = jnp.dot(h.astype(compute_dtype), w2_ref[...].astype(compute_dtype),
                 preferred_element_type=jnp.float32) + b2_ref[...]
    o_ref[...] = _sigmoid(z2, approx_recip).astype(o_ref.dtype)


def _cost(batch, f, h, l):
    flops = 2 * batch * (f * h + h * l) + 4 * batch * (h + l)
    transcendentals = batch * (h + l)  # one exp per sigmoid element
    bytes_accessed = 4 * (batch * f + f * h + h + h * l + l + batch * l)
    return pl.CostEstimate(flops=flops, transcendentals=transcendentals,
                           bytes_accessed=bytes_accessed)


@functools.partial(jax.jit, static_argnames=("use_bf16",))
def mlp_forward(x, w1, b1, w2, b2, *, use_bf16=False):
    """x: [B, F]; w1: [F, H]; b1: [1, H]; w2: [H, L]; b2: [1, L] -> [B, L]."""
    B, F = x.shape
    H = w1.shape[1]
    L = w2.shape[1]

    # Lane-dense output: pad L up to a full 128-lane tile so the final stores
    # are unmasked; padded (zero-weight/zero-bias) columns are sliced off.
    Lp = _round_up(L, _LANE)
    if Lp != L:
        w2 = jnp.pad(w2, ((0, 0), (0, Lp - L)))
        b2 = jnp.pad(b2, ((0, 0), (0, Lp - L)))

    compute_dtype = jnp.bfloat16 if use_bf16 else jnp.float32
    kernel = functools.partial(mlp_kernel, compute_dtype=compute_dtype,
                               approx_recip=use_bf16)

    if B < _TILED_BATCH_THRESHOLD:
        # Small batch: single block, no grid (everything fits VMEM trivially).
        vmem = pl.BlockSpec(memory_space=pltpu.MemorySpace.VMEM)
        out = pl.pallas_call(
            kernel,
            out_shape=jax.ShapeDtypeStruct((B, Lp), jnp.float32),
            in_specs=[vmem] * 5,
            out_specs=vmem,
            cost_estimate=_cost(B, F, H, Lp),
        )(x, w1, b1, w2, b2)
        return out[:, :L]

    # Large batch: tile over rows, keep weights resident, auto-pipelined DMA.
    TB = _TB
    Bp = _round_up(B, TB)
    if Bp != B:
        x = jnp.pad(x, ((0, Bp - B), (0, 0)))

    # Double-buffered x/out tiles + resident params, 2x headroom; clamp so it
    # stays safely below v7x's 64 MiB physical VMEM.
    tile_bytes = 2 * TB * (F + Lp) * 4 + (F * H + H + H * Lp + Lp) * 4
    vmem_limit = int(min(max(2 * tile_bytes, 16 << 20), 48 << 20))

    out = pl.pallas_call(
        kernel,
        out_shape=jax.ShapeDtypeStruct((Bp, Lp), jnp.float32),
        grid=(Bp // TB,),
        in_specs=[
            pl.BlockSpec((TB, F), lambda i: (i, 0)),   # x: batch-tiled
            pl.BlockSpec((F, H), lambda i: (0, 0)),    # w1: resident
            pl.BlockSpec((1, H), lambda i: (0, 0)),    # b1: resident
            pl.BlockSpec((H, Lp), lambda i: (0, 0)),   # w2: resident (padded)
            pl.BlockSpec((1, Lp), lambda i: (0, 0)),   # b2: resident (padded)
        ],
        out_specs=pl.BlockSpec((TB, Lp), lambda i: (i, 0)),
        compiler_params=pltpu.CompilerParams(
            dimension_semantics=("parallel",),
            vmem_limit_bytes=vmem_limit,
        ),
        cost_estimate=_cost(Bp, F, H, Lp),
    )(x, w1, b1, w2, b2)
    return out[:B, :L]


def init_linear_params(key, in_dim, out_dim):
    """Deterministic init matching nn.Linear default (uniform +-1/sqrt(in))."""
    k_w, k_b = jax.random.split(key)
    bound = 1.0 / math.sqrt(in_dim)
    # PyTorch stores weight as (out, in); we pre-transpose to (in, out).
    w = jax.random.uniform(k_w, (in_dim, out_dim), jnp.float32, -bound, bound)
    b = jax.random.uniform(k_b, (1, out_dim), jnp.float32, -bound, bound)
    return w, b


if __name__ == "__main__":
    # Shapes consistent with the module: MLP(no_features, no_hidden, no_labels)
    batch = 8
    no_features = 16
    no_hidden = 32
    no_labels = 4

    key = jax.random.PRNGKey(0)
    k_x, k_l1, k_l2, k_xl = jax.random.split(key, 4)

    x = jax.random.normal(k_x, (batch, no_features), jnp.float32)
    w1, b1 = init_linear_params(k_l1, no_features, no_hidden)
    w2, b2 = init_linear_params(k_l2, no_hidden, no_labels)

    def ref_mlp(xv):
        h = 1.0 / (1.0 + jnp.exp(-(xv @ w1 + b1)))
        return 1.0 / (1.0 + jnp.exp(-(h @ w2 + b2)))

    # 1) Small-batch path (single block, no grid), f32.
    out_small = mlp_forward(x, w1, b1, w2, b2)
    jax.block_until_ready(out_small)
    assert out_small.shape == (batch, no_labels)
    assert jnp.allclose(out_small, ref_mlp(x), atol=1e-4, rtol=1e-4)

    # 2) Large-batch path (batch-tiled grid, resident weights, parallel axis), f32.
    x_large = jax.random.normal(k_xl, (2048, no_features), jnp.float32)
    out_large = mlp_forward(x_large, w1, b1, w2, b2)
    jax.block_until_ready(out_large)
    assert out_large.shape == (2048, no_labels)
    assert jnp.allclose(out_large, ref_mlp(x_large), atol=1e-4, rtol=1e-4)

    # 3) Large-batch bf16-MXU path (f32 accumulation), looser tolerance.
    out_bf16 = mlp_forward(x_large, w1, b1, w2, b2, use_bf16=True)
    jax.block_until_ready(out_bf16)
    assert jnp.allclose(out_bf16, ref_mlp(x_large), atol=5e-2, rtol=5e-2)

    print("KERNEL_OK")
</pallas_src>

<mosaic_0001>
module attributes {stable_mosaic.version = 11 : i64} {
  func.func @mlp_kernel(%arg0: memref<8x16xf32, #tpu.memory_space<vmem>>, %arg1: memref<16x32xf32, #tpu.memory_space<vmem>>, %arg2: memref<1x32xf32, #tpu.memory_space<vmem>>, %arg3: memref<32x128xf32, #tpu.memory_space<vmem>>, %arg4: memref<1x128xf32, #tpu.memory_space<vmem>>, %arg5: memref<8x128xf32, #tpu.memory_space<vmem>>) attributes {dimension_semantics = [], scalar_prefetch = 0 : i64, scratch_operands = 0 : i64, tpu.core_type = #tpu.core_type<tc>} {
    %c0 = arith.constant 0 : index
    %c0_0 = arith.constant 0 : index
    %0 = vector.load %arg0[%c0, %c0_0] : memref<8x16xf32, #tpu.memory_space<vmem>>, vector<8x16xf32>
    %c0_1 = arith.constant 0 : index
    %c0_2 = arith.constant 0 : index
    %1 = vector.load %arg1[%c0_1, %c0_2] : memref<16x32xf32, #tpu.memory_space<vmem>>, vector<16x32xf32>
    %cst = arith.constant dense<0.000000e+00> : vector<8x32xf32>
    %2 = tpu.matmul %0, %1, %cst {dimension_numbers = #tpu.dot_dimension_numbers<[1], [0], [0], [1], [0, 0, 1, 1], [], []>} : vector<8x16xf32>, vector<16x32xf32>, vector<8x32xf32> -> vector<8x32xf32>
    %c0_3 = arith.constant 0 : index
    %c0_4 = arith.constant 0 : index
    %3 = vector.load %arg2[%c0_3, %c0_4] : memref<1x32xf32, #tpu.memory_space<vmem>>, vector<1x32xf32>
    %4 = vector.broadcast %3 : vector<1x32xf32> to vector<8x32xf32>
    %5 = arith.addf %2, %4 : vector<8x32xf32>
    %cst_5 = arith.constant 0.000000e+00 : f32
    %6 = vector.broadcast %cst_5 : f32 to vector<8x32xf32>
    %7 = arith.subf %6, %5 : vector<8x32xf32>
    %8 = math.exp %7 : vector<8x32xf32>
    %cst_6 = arith.constant 1.000000e+00 : f32
    %9 = vector.broadcast %cst_6 : f32 to vector<8x32xf32>
    %10 = arith.addf %9, %8 : vector<8x32xf32>
    %11 = tpu.reciprocal %10 : vector<8x32xf32> -> vector<8x32xf32>
    %c0_7 = arith.constant 0 : index
    %c0_8 = arith.constant 0 : index
    %12 = vector.load %arg3[%c0_7, %c0_8] : memref<32x128xf32, #tpu.memory_space<vmem>>, vector<32x128xf32>
    %cst_9 = arith.constant dense<0.000000e+00> : vector<8x128xf32>
    %13 = tpu.matmul %11, %12, %cst_9 {dimension_numbers = #tpu.dot_dimension_numbers<[1], [0], [0], [1], [0, 0, 1, 1], [], []>} : vector<8x32xf32>, vector<32x128xf32>, vector<8x128xf32> -> vector<8x128xf32>
    %c0_10 = arith.constant 0 : index
    %c0_11 = arith.constant 0 : index
    %14 = vector.load %arg4[%c0_10, %c0_11] : memref<1x128xf32, #tpu.memory_space<vmem>>, vector<1x128xf32>
    %15 = vector.broadcast %14 : vector<1x128xf32> to vector<8x128xf32>
    %16 = arith.addf %13, %15 : vector<8x128xf32>
    %cst_12 = arith.constant 0.000000e+00 : f32
    %17 = vector.broadcast %cst_12 : f32 to vector<8x128xf32>
    %18 = arith.subf %17, %16 : vector<8x128xf32>
    %19 = math.exp %18 : vector<8x128xf32>
    %cst_13 = arith.constant 1.000000e+00 : f32
    %20 = vector.broadcast %cst_13 : f32 to vector<8x128xf32>
    %21 = arith.addf %20, %19 : vector<8x128xf32>
    %22 = tpu.reciprocal %21 : vector<8x128xf32> -> vector<8x128xf32>
    %c0_14 = arith.constant 0 : index
    %c0_15 = arith.constant 0 : index
    %23 = vector.load %arg5[%c0_14, %c0_15] : memref<8x128xf32, #tpu.memory_space<vmem>>, vector<8x128xf32>
    tpu.vector_store %arg5[%c0_14, %c0_15], %22 {strides = array<i32>} : memref<8x128xf32, #tpu.memory_space<vmem>>, vector<8x128xf32>,
    return
  }
}

</mosaic_0001>

<bundles_post_ra>
// kernel: mlp_forward.1
= control target key start
LH: loop header
LB: loop body
LE: loop exit
PB: predicated region body
PF: predicated region fallthrough
CT: control target
= control target key end

     0   :  { %vm27_vm0 = vcmask 130048   ;;  %vm77_vm4 = vcmask 261120   ;;  %s196_s1 = inlined_call_operand.vmem [shape: f32[16,32], index: 1, kind: input, shape index: {}]   ;;  %s197_s0 = inlined_call_operand.vmem [shape: f32[8,16], index: 0, kind: input, shape index: {}]   ;;  %s198_s2 = inlined_call_operand.vmem [shape: f32[1,32], index: 2, kind: input, shape index: {}]   ;;  %s199_s4 = inlined_call_operand.vmem [shape: f32[1,128], index: 4, kind: input, shape index: {}]   ;;  %s200_s3 = inlined_call_operand.vmem [shape: f32[32,128], index: 3, kind: input, shape index: {}]   ;;  %s201_s5 = inlined_call_operand.vmem [shape: f32[8,128], index: 5, kind: output, shape index: {}]  }
   0x1   :  { %v22_v0 = vld [vmem:[%s196_s1 + $0x8] sm:$0xff]  ;;  %v21_v1 = vld [vmem:[%s196_s1] sm:$0xff]  ;;  %v72_v3 = vld [vmem:[%s200_s3 + $0x18] sm:$0xff] }
   0x2   :  { %45 = vmatpush.msra.mxu0 %v22_v0  ;;  %v20_v2 = vld [vmem:[%s197_s0] sm:$0xff]  ;;  %v71_v4 = vld [vmem:[%s200_s3 + $0x10] sm:$0xff]  ;;  %93 = vmatpush.msra.mxu1 %v72_v3  ;;  %v70_v5 = vld [vmem:[%s200_s3 + $0x8] sm:$0xff] }
   0x3   :  { %v69_v6 = vld [vmem:[%s200_s3] sm:$0xff] }
   0x4   :  { %46 = vmatpush.msra.mxu0 %v21_v1  ;;  %94 = vmatpush.msra.mxu1 %v71_v4  ;;  %v126_v7 = vld [vmem:[%s198_s2] ss:$0 sm:$0xff] }
   0x5   :  { %124 = vmatmul.msk.f32.vlgmr.msra.gmra.mxu0 %vm27_vm0, %v20_v2  ;;  %v127_v24 = vld [vmem:[%s199_s4] ss:$0 sm:$0xff] }
   0x6   :  { %95 = vmatpush.msra.mxu1 %v70_v5 }
   0x8   :  { %96 = vmatpush.msra.mxu1 %v69_v6 }
  0x82   :  { %v48_v8 = vpop.f32.mrf.mxu0 }
  0x83   :  { %v49_v9 = vadd.f32 %v126_v7, %v48_v8 }
  0x85   :  { %v51_v10 = vsub.f32 0.0, %v49_v9 }
  0x87   :  { %v52_v11 = vmul.f32 1.442695, %v51_v10 }
  0x89   :  { %128 = vpow2.f32 %v52_v11 }
  0x8f   :  { %v129_v12 = vpop.eup %128 }
  0x90   :  { %v54_v13 = vadd.f32 1.0, %v129_v12 }
  0x92   :  { %130 = vrcp.f32 %v54_v13  ;;  %v66_v17 = vand.u32 2147483648, %v54_v13  ;;  %v64_v19 = vand.u32 2147483647, %v54_v13  ;;  %vm60_vm2 = vweird.f32 %v54_v13 }
  0x94   :  { %v67_v21 = vor.u32 1.1754944e-38, %v66_v17  ;;  %vm65_vm5 = vcmp.eq.f32.partialorder %v64_v19, 8.507059e+37 }
  0x98   :  { %v131_v14 = vpop.eup %130 }
  0x99   :  { %v56_v15 = vmul.f32 %v131_v14, %v54_v13  ;;  %vm61_vm1 = vweird.f32 %v131_v14 }
  0x9a   :  { %vm62_vm3 = vmor %vm60_vm2, %vm61_vm1 }
  0x9b   :  { %v57_v16 = vsub.f32 1.0, %v56_v15 }
  0x9d   :  { %v58_v18 = vmul.f32 %v131_v14, %v57_v16 }
  0x9f   :  { %v59_v20 = vadd.f32 %v131_v14, %v58_v18 }
  0xa1   :  { %v63_v22 = vsel %vm62_vm3, %v131_v14, %v59_v20 }
  0xa2   :  { %v68_v23 = vsel %vm65_vm5, %v67_v21, %v63_v22 }
  0xa3   :  { %125 = vmatmul.msk.f32.vlgmr.msra.gmra.mxu1 %vm77_vm4, %v68_v23 }
 0x120   :  { %v98_v25 = vpop.f32.mrf.mxu1 }
 0x121   :  { %v99_v26 = vadd.f32 %v127_v24, %v98_v25 }
 0x123   :  { %v101_v27 = vsub.f32 0.0, %v99_v26 }
 0x125   :  { %v102_v28 = vmul.f32 1.442695, %v101_v27 }
 0x127   :  { %132 = vpow2.f32 %v102_v28 }
 0x12d   :  { %v133_v29 = vpop.eup %132 }
 0x12e   :  { %v104_v30 = vadd.f32 1.0, %v133_v29 }
 0x130   :  { %134 = vrcp.f32 %v104_v30  ;;  %v116_v34 = vand.u32 2147483648, %v104_v30  ;;  %v114_v36 = vand.u32 2147483647, %v104_v30  ;;  %vm110_vm7 = vweird.f32 %v104_v30 }
 0x132   :  { %v117_v38 = vor.u32 1.1754944e-38, %v116_v34  ;;  %vm115_vm9 = vcmp.eq.f32.partialorder %v114_v36, 8.507059e+37 }
 0x136   :  { %v135_v31 = vpop.eup %134 }
 0x137   :  { %v106_v32 = vmul.f32 %v135_v31, %v104_v30  ;;  %vm111_vm6 = vweird.f32 %v135_v31 }
 0x138   :  { %vm112_vm8 = vmor %vm110_vm7, %vm111_vm6 }
 0x139   :  { %v107_v33 = vsub.f32 1.0, %v106_v32 }
 0x13b   :  { %v108_v35 = vmul.f32 %v135_v31, %v107_v33 }
 0x13d   :  { %v109_v37 = vadd.f32 %v135_v31, %v108_v35 }
 0x13f   :  { %v113_v39 = vsel %vm112_vm8, %v135_v31, %v109_v37 }
 0x140   :  { %v118_v40 = vsel %vm115_vm9, %v117_v38, %v113_v39 }
 0x141   :  { %119 = vst [vmem:[%s201_s5] sm:$0xff] %v118_v40 }

</bundles_post_ra>
